<compile_context>
chip_gen: v6e
topology: v6e:2x2x1
jax: 0.10.0
libtpu: 0.0.40
codegen_flags: <defaults>
</compile_context>

<pallas_src>
import functools

import jax
import jax.numpy as jnp
from jax import lax
from jax.experimental import pallas as pl
from jax.experimental.pallas import tpu as pltpu


def _encoder_kernel(x_ref, w1_ref, b1_ref, w2_ref, b2_ref, wh_ref, bh_ref,
                    outT_ref):
    """One batch tile.

    x_ref    : (block_b, S)  f32, batch-major (no host-side transpose needed)
    outT_ref : (2L, block_b) f32, feature-major -> lane-dense full-width stores
    Weights are PyTorch-layout (out, in) bf16; biases are f32 column vectors.
    """
    x = x_ref[...].astype(w1_ref.dtype)                        # (Bt, S) bf16
    # ---- Layer 1: h1^T = W1 @ x^T via transposed-RHS dot_general (MXU) ----
    h = lax.dot_general(
        w1_ref[...], x,
        dimension_numbers=(((1,), (1,)), ((), ())),
        preferred_element_type=jnp.float32) + b1_ref[...]       # (H0, Bt) f32
    h = jnp.maximum(h, 0.0).astype(w2_ref.dtype)                # bf16 for next dot
    # ---- Layer 2: (H1, H0) @ (H0, Bt) -> (H1, Bt) ----
    h = jnp.dot(w2_ref[...], h,
                preferred_element_type=jnp.float32) + b2_ref[...]
    h = jnp.maximum(h, 0.0).astype(wh_ref.dtype)
    # ---- Fused heads [means; log_vars]: (2L, H1) @ (H1, Bt) -> (2L, Bt) ----
    outT_ref[...] = jnp.dot(wh_ref[...], h,
                            preferred_element_type=jnp.float32) + bh_ref[...]


def prepare_encoder_params(params, compute_dtype=jnp.bfloat16):
    """One-time repack of PyTorch-layout params for the kernel (call outside jit).

    Keeps weights in PyTorch (out_features, in_features) layout (exactly what
    the feature-major kernel wants), fuses the two heads, casts matmul operands
    to `compute_dtype`, and reshapes biases to broadcastable f32 columns.
    """
    w1 = params["w1"].astype(compute_dtype)                      # (H0, S)
    w2 = params["w2"].astype(compute_dtype)                      # (H1, H0)
    wh = jnp.concatenate([params["wm"], params["wv"]], axis=0    # (2L, H1)
                         ).astype(compute_dtype)
    b1 = params["b1"].astype(jnp.float32)[:, None]               # (H0, 1)
    b2 = params["b2"].astype(jnp.float32)[:, None]               # (H1, 1)
    bh = jnp.concatenate([params["bm"], params["bv"]], axis=0
                         ).astype(jnp.float32)[:, None]          # (2L, 1)
    return dict(w1=w1, b1=b1, w2=w2, b2=b2, wh=wh, bh=bh)


def _tensorcores_per_chip():
    """Best-effort TensorCore count (trace-time constant); 1 if unknown."""
    try:
        kind = jax.devices()[0].device_kind.lower()
    except Exception:  # pragma: no cover
        return 1
    if "lite" in kind or "v5e" in kind or "v6e" in kind:
        return 1
    if "v7" in kind or "v4" in kind or "v5p" in kind:
        return 2
    return 1


def _select_block_b(B, requested, num_cores):
    """Pick a lane-aligned batch tile (multiple of 128)."""
    b_pad = ((B + 127) // 128) * 128            # batch rounded up to a lane tile
    req = max(128, (requested // 128) * 128)    # requested, lane-aligned
    blk = min(req, b_pad)
    # 2-TC chips (v7x, v4/v5p): guarantee >= 2 tiles on the "parallel" axis
    # when there is enough batch to split, so the second core is not idle.
    if num_cores >= 2 and B >= 256:
        half = max(128, (((B + 1) // 2) // 128) * 128)
        blk = min(blk, half)
    return blk


@functools.partial(jax.jit, static_argnames=("block_b",))
def encoder_forward(x, prep, block_b=512):
    """x: [B, state_dim] float32.  prep: output of prepare_encoder_params."""
    B, state_dim = x.shape
    w1, b1 = prep["w1"], prep["b1"]
    w2, b2 = prep["w2"], prep["b2"]
    wh, bh = prep["wh"], prep["bh"]
    H0 = w1.shape[0]
    H1 = w2.shape[0]
    L2 = wh.shape[0]
    L = L2 // 2

    blk = _select_block_b(B, block_b, _tensorcores_per_chip())
    num_tiles = pl.cdiv(B, blk)
    Bp = num_tiles * blk

    # Pad the batch (rows) to a whole number of lane-aligned tiles.  Padded
    # rows flow through the kernel as ReLU(bias) garbage and are sliced off
    # below: wasted lanes on the tail tile only, never read as real output.
    xp = x if Bp == B else jnp.pad(x, ((0, Bp - B), (0, 0)))

    # Grid-invariant operands: constant block index -> DMA'd once by the
    # pipeline.  (pl.Buffered(1) pinning deliberately skipped; see header.)
    full = lambda shape: pl.BlockSpec(shape, lambda i: (0, 0))

    compiler_kwargs = dict(dimension_semantics=("parallel",))
    if blk > 512:
        # Tiles > 512 approach v5e's 16 MiB default scoped-VMEM window; bump
        # to 32 MiB (already the default on v6e/v7x).
        compiler_kwargs["vmem_limit_bytes"] = 32 * 1024 * 1024

    outT = pl.pallas_call(
        _encoder_kernel,
        out_shape=jax.ShapeDtypeStruct((L2, Bp), jnp.float32),
        grid_spec=pltpu.PrefetchScalarGridSpec(
            num_scalar_prefetch=0,
            grid=(num_tiles,),
            in_specs=[
                pl.BlockSpec((blk, state_dim), lambda i: (i, 0)),  # x tile (batch-major)
                full((H0, state_dim)), full((H0, 1)),              # layer 1
                full((H1, H0)), full((H1, 1)),                     # layer 2
                full((L2, H1)), full((L2, 1)),                     # fused heads
            ],
            out_specs=pl.BlockSpec((L2, blk), lambda i: (0, i)),
        ),
        compiler_params=pltpu.CompilerParams(**compiler_kwargs),
    )(xp, w1, b1, w2, b2, wh, bh)

    # Single small transpose + column split on the way out.
    out = outT[:, :B].T                      # (B, 2L)
    return out[:, :L], out[:, L:]


def init_encoder_params(key, state_dim, latent_dim, hidden_dims=(512, 512)):
    """Deterministic synthetic init (PyTorch nn.Linear weight layout (out, in))."""
    assert len(hidden_dims) == 2, "kernel is specialized to 2 hidden layers"
    h0, h1 = hidden_dims
    ks = jax.random.split(key, 8)

    def lin(kw, kb, fan_in, fan_out):
        bound = 1.0 / jnp.sqrt(fan_in)
        w = jax.random.uniform(kw, (fan_out, fan_in), jnp.float32, -bound, bound)
        b = jax.random.uniform(kb, (fan_out,), jnp.float32, -bound, bound)
        return w, b

    w1, b1 = lin(ks[0], ks[1], state_dim, h0)
    w2, b2 = lin(ks[2], ks[3], h0, h1)
    wm, bm = lin(ks[4], ks[5], h1, latent_dim)
    wv, bv = lin(ks[6], ks[7], h1, latent_dim)
    return dict(w1=w1, b1=b1, w2=w2, b2=b2, wm=wm, bm=bm, wv=wv, bv=bv)


def encoder_reference(x, p):
    """Pure-JAX f32 reference of the PyTorch forward."""
    h = jnp.maximum(x @ p["w1"].T + p["b1"], 0.0)
    h = jnp.maximum(h @ p["w2"].T + p["b2"], 0.0)
    return h @ p["wm"].T + p["bm"], h @ p["wv"].T + p["bv"]


def encoder_reference_bf16(x, p, compute_dtype=jnp.bfloat16):
    """Reference mirroring the kernel's per-layer bf16 operands / f32 accumulate."""
    f32 = jnp.float32
    h = jnp.dot(x.astype(compute_dtype), p["w1"].astype(compute_dtype).T,
                preferred_element_type=f32) + p["b1"]
    h = jnp.maximum(h, 0.0).astype(compute_dtype)
    h = jnp.dot(h, p["w2"].astype(compute_dtype).T,
                preferred_element_type=f32) + p["b2"]
    h = jnp.maximum(h, 0.0).astype(compute_dtype)
    m = jnp.dot(h, p["wm"].astype(compute_dtype).T,
                preferred_element_type=f32) + p["bm"]
    v = jnp.dot(h, p["wv"].astype(compute_dtype).T,
                preferred_element_type=f32) + p["bv"]
    return m, v


if __name__ == "__main__":
    key = jax.random.PRNGKey(0)
    k_x, k_p = jax.random.split(key)

    B, state_dim, latent_dim = 8, 32, 16
    hidden_dims = (128, 128)   # small variant of the default [512, 512]

    x = jax.random.normal(k_x, (B, state_dim), jnp.float32)
    params = init_encoder_params(k_p, state_dim, latent_dim, hidden_dims)
    prep = prepare_encoder_params(params)   # one-time repack (outside jit)

    means, log_vars = encoder_forward(x, prep)
    jax.block_until_ready((means, log_vars))

    assert means.shape == (B, latent_dim) and log_vars.shape == (B, latent_dim)

    # Tight check against a reference that mimics the kernel's bf16 rounding
    # (isolates real kernel bugs from expected bf16 quantization)...
    ref_m16, ref_v16 = encoder_reference_bf16(x, params)
    assert jnp.allclose(means, ref_m16, atol=1e-3, rtol=1e-3)
    assert jnp.allclose(log_vars, ref_v16, atol=1e-3, rtol=1e-3)
    # ...and a loose check against the full-f32 PyTorch-equivalent reference.
    ref_m32, ref_v32 = encoder_reference(x, params)
    assert jnp.allclose(means, ref_m32, atol=3e-2, rtol=3e-2)
    assert jnp.allclose(log_vars, ref_v32, atol=3e-2, rtol=3e-2)

    print("KERNEL_OK")
</pallas_src>

<mosaic_0001>
module attributes {stable_mosaic.version = 11 : i64} {
  func.func @_encoder_kernel(%arg0: i32, %arg1: memref<128x32xf32, #tpu.memory_space<vmem>>, %arg2: memref<128x32xbf16, #tpu.memory_space<vmem>>, %arg3: memref<128x1xf32, #tpu.memory_space<vmem>>, %arg4: memref<128x128xbf16, #tpu.memory_space<vmem>>, %arg5: memref<128x1xf32, #tpu.memory_space<vmem>>, %arg6: memref<32x128xbf16, #tpu.memory_space<vmem>>, %arg7: memref<32x1xf32, #tpu.memory_space<vmem>>, %arg8: memref<32x128xf32, #tpu.memory_space<vmem>>) attributes {dimension_semantics = [#tpu.dimension_semantics<parallel>], iteration_bounds = array<i64: 1>, scalar_prefetch = 0 : i64, scratch_operands = 0 : i64, tpu.core_type = #tpu.core_type<tc>, window_params = [{transform_indices = @transform_0, window_bounds = array<i64: 128, 32>}, {pipeline_mode = #tpu.pipeline_mode<synchronous>, transform_indices = @transform_1, window_bounds = array<i64: 128, 32>}, {pipeline_mode = #tpu.pipeline_mode<synchronous>, transform_indices = @transform_2, window_bounds = array<i64: 128, 1>}, {pipeline_mode = #tpu.pipeline_mode<synchronous>, transform_indices = @transform_3, window_bounds = array<i64: 128, 128>}, {pipeline_mode = #tpu.pipeline_mode<synchronous>, transform_indices = @transform_4, window_bounds = array<i64: 128, 1>}, {pipeline_mode = #tpu.pipeline_mode<synchronous>, transform_indices = @transform_5, window_bounds = array<i64: 32, 128>}, {pipeline_mode = #tpu.pipeline_mode<synchronous>, transform_indices = @transform_6, window_bounds = array<i64: 32, 1>}, {transform_indices = @transform_7, window_bounds = array<i64: 32, 128>}]} {
    %c0 = arith.constant 0 : index
    %c0_0 = arith.constant 0 : index
    %0 = vector.load %arg1[%c0, %c0_0] : memref<128x32xf32, #tpu.memory_space<vmem>>, vector<128x32xf32>
    %1 = arith.truncf %0 : vector<128x32xf32> to vector<128x32xbf16>
    %c0_1 = arith.constant 0 : index
    %c0_2 = arith.constant 0 : index
    %2 = vector.load %arg2[%c0_1, %c0_2] : memref<128x32xbf16, #tpu.memory_space<vmem>>, vector<128x32xbf16>
    %cst = arith.constant dense<0.000000e+00> : vector<128x128xf32>
    %3 = tpu.matmul %2, %1, %cst {dimension_numbers = #tpu.dot_dimension_numbers<[1], [1], [0], [0], [0, 0, 1, 0], [], []>} : vector<128x32xbf16>, vector<128x32xbf16>, vector<128x128xf32> -> vector<128x128xf32>
    %c0_3 = arith.constant 0 : index
    %c0_4 = arith.constant 0 : index
    %4 = vector.load %arg3[%c0_3, %c0_4] : memref<128x1xf32, #tpu.memory_space<vmem>>, vector<128x1xf32>
    %5 = vector.broadcast %4 : vector<128x1xf32> to vector<128x128xf32>
    %6 = arith.addf %3, %5 : vector<128x128xf32>
    %cst_5 = arith.constant 0.000000e+00 : f32
    %7 = vector.broadcast %cst_5 : f32 to vector<128x128xf32>
    %8 = arith.maximumf %6, %7 : vector<128x128xf32>
    %9 = arith.truncf %8 : vector<128x128xf32> to vector<128x128xbf16>
    %c0_6 = arith.constant 0 : index
    %c0_7 = arith.constant 0 : index
    %10 = vector.load %arg4[%c0_6, %c0_7] : memref<128x128xbf16, #tpu.memory_space<vmem>>, vector<128x128xbf16>
    %cst_8 = arith.constant dense<0.000000e+00> : vector<128x128xf32>
    %11 = tpu.matmul %10, %9, %cst_8 {dimension_numbers = #tpu.dot_dimension_numbers<[1], [0], [0], [1], [0, 0, 1, 1], [], []>} : vector<128x128xbf16>, vector<128x128xbf16>, vector<128x128xf32> -> vector<128x128xf32>
    %c0_9 = arith.constant 0 : index
    %c0_10 = arith.constant 0 : index
    %12 = vector.load %arg5[%c0_9, %c0_10] : memref<128x1xf32, #tpu.memory_space<vmem>>, vector<128x1xf32>
    %13 = vector.broadcast %12 : vector<128x1xf32> to vector<128x128xf32>
    %14 = arith.addf %11, %13 : vector<128x128xf32>
    %cst_11 = arith.constant 0.000000e+00 : f32
    %15 = vector.broadcast %cst_11 : f32 to vector<128x128xf32>
    %16 = arith.maximumf %14, %15 : vector<128x128xf32>
    %17 = arith.truncf %16 : vector<128x128xf32> to vector<128x128xbf16>
    %c0_12 = arith.constant 0 : index
    %c0_13 = arith.constant 0 : index
    %18 = vector.load %arg6[%c0_12, %c0_13] : memref<32x128xbf16, #tpu.memory_space<vmem>>, vector<32x128xbf16>
    %cst_14 = arith.constant dense<0.000000e+00> : vector<32x128xf32>
    %19 = tpu.matmul %18, %17, %cst_14 {dimension_numbers = #tpu.dot_dimension_numbers<[1], [0], [0], [1], [0, 0, 1, 1], [], []>} : vector<32x128xbf16>, vector<128x128xbf16>, vector<32x128xf32> -> vector<32x128xf32>
    %c0_15 = arith.constant 0 : index
    %c0_16 = arith.constant 0 : index
    %20 = vector.load %arg7[%c0_15, %c0_16] : memref<32x1xf32, #tpu.memory_space<vmem>>, vector<32x1xf32>
    %21 = vector.broadcast %20 : vector<32x1xf32> to vector<32x128xf32>
    %22 = arith.addf %19, %21 : vector<32x128xf32>
    %c0_17 = arith.constant 0 : index
    %c0_18 = arith.constant 0 : index
    %23 = vector.load %arg8[%c0_17, %c0_18] : memref<32x128xf32, #tpu.memory_space<vmem>>, vector<32x128xf32>
    tpu.vector_store %arg8[%c0_17, %c0_18], %22 {strides = array<i32>} : memref<32x128xf32, #tpu.memory_space<vmem>>, vector<32x128xf32>,
    return
  }
  func.func @transform_0(%arg0: i32) -> (i32, i32) {
    %c0_i32 = arith.constant 0 : i32
    %c0_i32_0 = arith.constant 0 : i32
    return %arg0, %c0_i32 : i32, i32
  }
  func.func @transform_1(%arg0: i32) -> (i32, i32) {
    %c0_i32 = arith.constant 0 : i32
    %c0_i32_0 = arith.constant 0 : i32
    %c0_i32_1 = arith.constant 0 : i32
    return %c0_i32, %c0_i32_0 : i32, i32
  }
  func.func @transform_2(%arg0: i32) -> (i32, i32) {
    %c0_i32 = arith.constant 0 : i32
    %c0_i32_0 = arith.constant 0 : i32
    %c0_i32_1 = arith.constant 0 : i32
    return %c0_i32, %c0_i32_0 : i32, i32
  }
  func.func @transform_3(%arg0: i32) -> (i32, i32) {
    %c0_i32 = arith.constant 0 : i32
    %c0_i32_0 = arith.constant 0 : i32
    %c0_i32_1 = arith.constant 0 : i32
    return %c0_i32, %c0_i32_0 : i32, i32
  }
  func.func @transform_4(%arg0: i32) -> (i32, i32) {
    %c0_i32 = arith.constant 0 : i32
    %c0_i32_0 = arith.constant 0 : i32
    %c0_i32_1 = arith.constant 0 : i32
    return %c0_i32, %c0_i32_0 : i32, i32
  }
  func.func @transform_5(%arg0: i32) -> (i32, i32) {
    %c0_i32 = arith.constant 0 : i32
    %c0_i32_0 = arith.constant 0 : i32
    %c0_i32_1 = arith.constant 0 : i32
    return %c0_i32, %c0_i32_0 : i32, i32
  }
  func.func @transform_6(%arg0: i32) -> (i32, i32) {
    %c0_i32 = arith.constant 0 : i32
    %c0_i32_0 = arith.constant 0 : i32
    %c0_i32_1 = arith.constant 0 : i32
    return %c0_i32, %c0_i32_0 : i32, i32
  }
  func.func @transform_7(%arg0: i32) -> (i32, i32) {
    %c0_i32 = arith.constant 0 : i32
    %c0_i32_0 = arith.constant 0 : i32
    return %c0_i32, %arg0 : i32, i32
  }
}

</mosaic_0001>

<bundles_post_ra>
// kernel: encoder_forward.1
= control target key start
LH: loop header
LB: loop body
LE: loop exit
PB: predicated region body
PF: predicated region fallthrough
CT: control target
= control target key end

     0   :  { %vm203_vm0 = vcmask 261120   ;;  %v932_v3 = vmov 0   ;;  %s1237_s0 = inlined_call_operand.vmem [shape: f32[128,32], index: 0, kind: input, shape index: {}]   ;;  %s1238_s1 = inlined_call_operand.vmem [shape: bf16[128,32], index: 1, kind: input, shape index: {}]   ;;  %s1239_s2 = inlined_call_operand.vmem [shape: f32[128,1], index: 2, kind: input, shape index: {}]   ;;  %s1240_s4 = inlined_call_operand.vmem [shape: f32[128,1], index: 4, kind: input, shape index: {}]   ;;  %s1241_s6 = inlined_call_operand.vmem [shape: f32[32,1], index: 6, kind: input, shape index: {}]   ;;  %s1242_s3 = inlined_call_operand.vmem [shape: bf16[128,128], index: 3, kind: input, shape index: {}]   ;;  %s1243_s5 = inlined_call_operand.vmem [shape: bf16[32,128], index: 5, kind: input, shape index: {}]   ;;  %s1244_s7 = inlined_call_operand.vmem [shape: f32[32,128], index: 7, kind: output, shape index: {}]  }
   0x1   :  { %v41_v0 = vld [vmem:[%s1237_s0 + $0x70] sm:$0xff]  ;;  %v42_v1 = vld [vmem:[%s1237_s0 + $0x78] sm:$0xff]  ;;  %v39_v2 = vld [vmem:[%s1237_s0 + $0x60] sm:$0xff]  ;;  %912 = vset.pattern.permute.xlu0 %v932_v3  ;;  %913 = vset.pattern.permute.xlu1 %v932_v3 }
   0x2   :  { %v50_v4 = vpack.c.bf16 %v42_v1, %v41_v0  ;;  %v40_v5 = vld [vmem:[%s1237_s0 + $0x68] sm:$0xff]  ;;  %v37_v8 = vld [vmem:[%s1237_s0 + $0x50] sm:$0xff]  ;;  %v38_v9 = vld [vmem:[%s1237_s0 + $0x58] sm:$0xff] }
   0x3   :  { %v49_v6 = vpack.c.bf16 %v40_v5, %v39_v2  ;;  %v914_v10 = vld [vmem:[%s1238_s1] sm:$0xff]   ;;  %v48_v12 = vpack.c.bf16 %v38_v9, %v37_v8  ;;  %v81_v13 = vld [vmem:[%s1239_s2 + $0x70] sm:$0xff]  ;;  %v36_v15 = vld [vmem:[%s1237_s0 + $0x48] sm:$0xff] }
   0x4   :  { %903 = vmatprep.subr.msk.bf16.mxu0 %vm203_vm0, %v50_v4  ;;  %v250_v7 = vsel %vm203_vm0, %v50_v4, 0  ;;  %835 = vmatprep.mubr.msk.bf16.mxu0 %vm203_vm0, %v914_v10  ;;  %v35_v14 = vld [vmem:[%s1237_s0 + $0x40] sm:$0xff]  ;;  %v82_v17 = vld [vmem:[%s1239_s2 + $0x78] sm:$0xff]  ;;  %v80_v18 = vld [vmem:[%s1239_s2 + $0x68] sm:$0xff] }
   0x5   :  { %820 = vmatpush3.bf16.xpose.msra.mxu0 %v250_v7  ;;  %v247_v11 = vsel %vm203_vm0, %v49_v6, 0  ;;  %155 = vperm.xlu0 %912, %v81_v13   ;;  %v79_v16 = vld [vmem:[%s1239_s2 + $0x60] sm:$0xff]  ;;  %v244_v19 = vsel %vm203_vm0, %v48_v12, 0  ;;  %v47_v20 = vpack.c.bf16 %v36_v15, %v35_v14  ;;  %v77_v21 = vld [vmem:[%s1239_s2 + $0x50] sm:$0xff]  ;;  %v78_v22 = vld [vmem:[%s1239_s2 + $0x58] sm:$0xff] }
   0x6   :  { %904 = vmatprep.subr.msk.bf16.mxu0 %vm203_vm0, %v49_v6  ;;  %145 = vperm.xlu1 %913, %v79_v16   ;;  %v33_v23 = vld [vmem:[%s1237_s0 + $0x30] sm:$0xff]  ;;  %v34_v24 = vld [vmem:[%s1237_s0 + $0x38] sm:$0xff]  ;;  %v75_v25 = vld [vmem:[%s1239_s2 + $0x40] sm:$0xff] }
   0x7   :  { %v76_v26 = vld [vmem:[%s1239_s2 + $0x48] sm:$0xff]  ;;  %v241_v27 = vsel %vm203_vm0, %v47_v20, 0  ;;  %v46_v28 = vpack.c.bf16 %v34_v24, %v33_v23  ;;  %v73_v29 = vld [vmem:[%s1239_s2 + $0x30] sm:$0xff]  ;;  %v74_v30 = vld [vmem:[%s1239_s2 + $0x38] sm:$0xff] }
   0x8   :  { %v31_v31 = vld [vmem:[%s1237_s0 + $0x20] sm:$0xff]  ;;  %v32_v32 = vld [vmem:[%s1237_s0 + $0x28] sm:$0xff]  ;;  %v69_v37 = vld [vmem:[%s1239_s2 + $0x10] sm:$0xff] }
   0x9   :  { %160 = vperm.xlu0 %912, %v82_v17   ;;  %v71_v33 = vld [vmem:[%s1239_s2 + $0x20] sm:$0xff]  ;;  %v72_v34 = vld [vmem:[%s1239_s2 + $0x28] sm:$0xff]  ;;  %v238_v35 = vsel %vm203_vm0, %v46_v28, 0  ;;  %v45_v36 = vpack.c.bf16 %v32_v32, %v31_v31  ;;  %v70_v38 = vld [vmem:[%s1239_s2 + $0x18] sm:$0xff] }
   0xa   :  { %150 = vperm.xlu1 %913, %v80_v18   ;;  %v29_v39 = vld [vmem:[%s1237_s0 + $0x10] sm:$0xff]  ;;  %v30_v40 = vld [vmem:[%s1237_s0 + $0x18] sm:$0xff]  ;;  %v67_v41 = vld [vmem:[%s1239_s2] sm:$0xff] }
   0xb   :  { %v68_v42 = vld [vmem:[%s1239_s2 + $0x8] sm:$0xff]  ;;  %v235_v43 = vsel %vm203_vm0, %v45_v36, 0  ;;  %v44_v44 = vpack.c.bf16 %v30_v40, %v29_v39  ;;  %v403_v45 = vld [vmem:[%s1240_s4 + $0x70] sm:$0xff]  ;;  %v404_v46 = vld [vmem:[%s1240_s4 + $0x78] sm:$0xff] }
   0xc   :  { %v27_v47 = vld [vmem:[%s1237_s0] sm:$0xff]  ;;  %v28_v48 = vld [vmem:[%s1237_s0 + $0x8] sm:$0xff]  ;;  %v399_v53 = vld [vmem:[%s1240_s4 + $0x50] sm:$0xff] }
   0xd   :  { %822 = vmatpush3.bf16.xpose.msra.mxu0 %v247_v11  ;;  %135 = vperm.xlu0 %912, %v77_v21   ;;  %v401_v49 = vld [vmem:[%s1240_s4 + $0x60] sm:$0xff]  ;;  %v402_v50 = vld [vmem:[%s1240_s4 + $0x68] sm:$0xff]  ;;  %v232_v51 = vsel %vm203_vm0, %v44_v44, 0  ;;  %v43_v52 = vpack.c.bf16 %v28_v48, %v27_v47  ;;  %v400_v54 = vld [vmem:[%s1240_s4 + $0x58] sm:$0xff] }
   0xe   :  { %905 = vmatprep.subr.msk.bf16.mxu0 %vm203_vm0, %v48_v12  ;;  %140 = vperm.xlu1 %913, %v78_v22   ;;  %v397_v55 = vld [vmem:[%s1240_s4 + $0x40] sm:$0xff]  ;;  %v398_v56 = vld [vmem:[%s1240_s4 + $0x48] sm:$0xff]  ;;  %v395_v58 = vld [vmem:[%s1240_s4 + $0x30] sm:$0xff] }
   0xf   :  { %v229_v57 = vsel %vm203_vm0, %v43_v52, 0  ;;  %v396_v59 = vld [vmem:[%s1240_s4 + $0x38] sm:$0xff]  ;;  %v915_v60 = vld [vmem:[%s1238_s1 + $0x8] sm:$0xff]   ;;  %v393_v61 = vld [vmem:[%s1240_s4 + $0x20] sm:$0xff] }
  0x10   :  { %v916_v62 = vld [vmem:[%s1238_s1 + $0x10] sm:$0xff]   ;;  %v394_v63 = vld [vmem:[%s1240_s4 + $0x28] sm:$0xff]  ;;  %v392_v1 = vld [vmem:[%s1240_s4 + $0x18] sm:$0xff] }
  0x11   :  { %125 = vperm.xlu0 %912, %v75_v25   ;;  %v391_v0 = vld [vmem:[%s1240_s4 + $0x10] sm:$0xff]  ;;  %v917_v2 = vld [vmem:[%s1238_s1 + $0x18] sm:$0xff]   ;;  %v389_v3 = vld [vmem:[%s1240_s4] sm:$0xff] }
  0x12   :  { %130 = vperm.xlu1 %913, %v76_v26   ;;  %v918_v4 = vld [vmem:[%s1238_s1 + $0x20] sm:$0xff]   ;;  %v390_v5 = vld [vmem:[%s1240_s4 + $0x8] sm:$0xff]  ;;  %v660_v9 = vld [vmem:[%s1241_s6 + $0x10] sm:$0xff] }
  0x13   :  { %v658_v6 = vld [vmem:[%s1241_s6] sm:$0xff]  ;;  %v659_v7 = vld [vmem:[%s1241_s6 + $0x8] sm:$0xff]  ;;  %v920_v10 = vld [vmem:[%s1238_s1 + $0x30] sm:$0xff]  }
  0x14   :  { %v919_v8 = vld [vmem:[%s1238_s1 + $0x28] sm:$0xff]   ;;  %v661_v11 = vld [vmem:[%s1241_s6 + $0x18] sm:$0xff]  ;;  %v922_v13 = vld [vmem:[%s1242_s3] sm:$0xff]  }
  0x15   :  { %824 = vmatpush3.bf16.xpose.msra.mxu0 %v244_v19  ;;  %115 = vperm.xlu0 %912, %v73_v29   ;;  %v921_v12 = vld [vmem:[%s1238_s1 + $0x38] sm:$0xff]  }
  0x16   :  { %906 = vmatprep.subr.msk.bf16.mxu0 %vm203_vm0, %v47_v20  ;;  %120 = vperm.xlu1 %913, %v74_v30  }
  0x17   :  { %867 = vmatprep.mubr.bf16.mxu1 %v922_v13 }
  0x19   :  { %105 = vperm.xlu0 %912, %v71_v33  }
  0x1a   :  { %110 = vperm.xlu1 %913, %v72_v34  }
  0x1d   :  { %826 = vmatpush3.bf16.xpose.msra.mxu0 %v241_v27  ;;  %95 = vperm.xlu0 %912, %v69_v37  }
  0x1e   :  { %907 = vmatprep.subr.msk.bf16.mxu0 %vm203_vm0, %v46_v28  ;;  %100 = vperm.xlu1 %913, %v70_v38  }
  0x21   :  { %85 = vperm.xlu0 %912, %v67_v41  }
  0x22   :  { %90 = vperm.xlu1 %913, %v68_v42  }
  0x25   :  { %828 = vmatpush3.bf16.xpose.msra.mxu0 %v238_v35  ;;  %477 = vperm.xlu0 %912, %v403_v45  }
  0x26   :  { %908 = vmatprep.subr.msk.bf16.mxu0 %vm203_vm0, %v45_v36  ;;  %482 = vperm.xlu1 %913, %v404_v46  }
  0x29   :  { %467 = vperm.xlu0 %912, %v401_v49  }
  0x2a   :  { %472 = vperm.xlu1 %913, %v402_v50  }
  0x2d   :  { %830 = vmatpush3.bf16.xpose.msra.mxu0 %v235_v43  ;;  %457 = vperm.xlu0 %912, %v399_v53  }
  0x2e   :  { %909 = vmatprep.subr.msk.bf16.mxu0 %vm203_vm0, %v44_v44  ;;  %462 = vperm.xlu1 %913, %v400_v54  }
  0x31   :  { %447 = vperm.xlu0 %912, %v397_v55  }
  0x32   :  { %452 = vperm.xlu1 %913, %v398_v56  }
  0x35   :  { %832 = vmatpush3.bf16.xpose.msra.mxu0 %v232_v51  ;;  %437 = vperm.xlu0 %912, %v395_v58  }
  0x36   :  { %910 = vmatprep.subr.msk.bf16.mxu0 %vm203_vm0, %v43_v52  ;;  %442 = vperm.xlu1 %913, %v396_v59  }
  0x39   :  { %427 = vperm.xlu0 %912, %v393_v61  }
  0x3a   :  { %432 = vperm.xlu1 %913, %v394_v63  }
  0x3d   :  { %834 = vmatpush3.bf16.xpose.msra.mxu0 %v229_v57  ;;  %417 = vperm.xlu0 %912, %v391_v0  }
  0x3e   :  { %422 = vperm.xlu1 %913, %v392_v1  }
  0x41   :  { %407 = vperm.xlu0 %912, %v389_v3  }
  0x42   :  { %412 = vperm.xlu1 %913, %v390_v5  }
  0x44   :  { %836 = vmatmul.mubr.msk.bf16.vlgmr.msra.gmra.mxu0 %vm203_vm0, %v915_v60 }
  0x45   :  { %839 = vmatprep.mubr.msk.bf16.mxu0 %vm203_vm0, %v916_v62  ;;  %664 = vperm.xlu0 %912, %v658_v6  }
  0x46   :  { %669 = vperm.xlu1 %913, %v659_v7  }
  0x49   :  { %674 = vperm.xlu0 %912, %v660_v9  }
  0x4a   :  { %679 = vperm.xlu1 %913, %v661_v11  }
  0x4c   :  { %840 = vmatmul.mubr.msk.bf16.gmra.mxu0 %vm203_vm0, %v917_v2 }
  0x4d   :  { %843 = vmatprep.mubr.msk.bf16.mxu0 %vm203_vm0, %v918_v4 }
  0x54   :  { %844 = vmatmul.mubr.msk.bf16.gmra.mxu0 %vm203_vm0, %v919_v8 }
  0x55   :  { %847 = vmatprep.mubr.msk.bf16.mxu0 %vm203_vm0, %v920_v10 }
  0x5c   :  { %848 = vmatmul.mubr.msk.bf16.gmra.mxu0 %vm203_vm0, %v921_v12 }
  0x80   :  { %v156_v20 = vpop.permute.xlu0 %155 }
  0x81   :  { %v146_v18 = vpop.permute.xlu1 %145 }
  0x84   :  { %v161_v25 = vpop.permute.xlu0 %160 }
  0x85   :  { %v151_v23 = vpop.permute.xlu1 %150 }
  0x88   :  { %v136_v30 = vpop.permute.xlu0 %135 }
  0x89   :  { %v141_v28 = vpop.permute.xlu1 %140 }
  0x8c   :  { %v126_v36 = vpop.permute.xlu0 %125 }
  0x8d   :  { %v131_v33 = vpop.permute.xlu1 %130 }
  0x90   :  { %v116_v50 = vpop.permute.xlu0 %115 }
  0x91   :  { %v121_v45 = vpop.permute.xlu1 %120 }
  0x94   :  { %v106_v60 = vpop.permute.xlu0 %105 }
  0x95   :  { %v111_v56 = vpop.permute.xlu1 %110 }
  0x98   :  { %v96_v5 = vpop.permute.xlu0 %95 }
  0x99   :  { %v101_v2 = vpop.permute.xlu1 %100 }
  0x9d   :  { %v91_v11 = vpop.permute.xlu1 %90 }
 0x104   :  { %v1180_v14 = vpop.f32.mrf.mxu0 }
 0x105   :  { %v295_v9 = vadd.f32 %v1180_v14, %v96_v5  ;;  %v923_v14 = vld [vmem:[%s1242_s3 + $0x8] sm:$0xff]  }
 0x106   :  { %v1182_v15 = vpop.f32.mrf.mxu0 }
 0x108   :  { %v838_v16 = vpop.f32.mrf.mxu0 }
 0x109   :  { %v298_v6 = vadd.f32 %v838_v16, %v101_v2 }
 0x10a   :  { %v1184_v17 = vpop.f32.mrf.mxu0 }
 0x10b   :  { %v352_v12 = vmax.f32 %v298_v6, 0.0  ;;  %v290_v13 = vadd.f32 %v1184_v17, %v91_v11  ;;  %v924_v17 = vld [vmem:[%s1242_s3 + $0x10] sm:$0xff]  }
 0x10c   :  { %v841_v19 = vpop.f32.mrf.mxu0 }
 0x10d   :  { %v311_v61 = vadd.f32 %v841_v19, %v116_v50  ;;  %v86_v19 = vpop.permute.xlu0 %85  ;;  %v350_v16 = vmax.f32 %v290_v13, 0.0 }
 0x10e   :  { %v302_v21 = vpop.f32.mrf.mxu0 }
 0x10f   :  { %v355_v3 = vmax.f32 %v311_v61, 0.0  ;;  %v303_v4 = vadd.f32 %v302_v21, %v106_v60  ;;  %v287_v21 = vadd.f32 %v1182_v15, %v86_v19  ;;  %v925_v15 = vld [vmem:[%s1242_s3 + $0x18] sm:$0xff]  }
 0x110   :  { %v842_v22 = vpop.f32.mrf.mxu0 }
 0x111   :  { %v314_v57 = vadd.f32 %v842_v22, %v121_v45  ;;  %v353_v10 = vmax.f32 %v303_v4, 0.0 }
 0x112   :  { %v305_v24 = vpop.f32.mrf.mxu0 }
 0x113   :  { %v356_v63 = vmax.f32 %v314_v57, 0.0  ;;  %v306_v0 = vadd.f32 %v305_v24, %v111_v56 }
 0x114   :  { %v845_v26 = vpop.f32.mrf.mxu0 }
 0x115   :  { %v327_v46 = vadd.f32 %v845_v26, %v136_v30  ;;  %v368_v7 = vpack.c.bf16 %v356_v63, %v355_v3  ;;  %v354_v8 = vmax.f32 %v306_v0, 0.0  ;;  %v927_v26 = vld [vmem:[%s1242_s3 + $0x28] sm:$0xff]  }
 0x116   :  { %v318_v27 = vpop.f32.mrf.mxu0 }
 0x117   :  { %v359_v54 = vmax.f32 %v327_v46, 0.0  ;;  %v319_v55 = vadd.f32 %v318_v27, %v126_v36  ;;  %v928_v27 = vld [vmem:[%s1242_s3 + $0x30] sm:$0xff]   ;;  %v478_v36 = vpop.permute.xlu0 %477 }
 0x118   :  { %v846_v29 = vpop.f32.mrf.mxu0 }
 0x119   :  { %v330_v41 = vadd.f32 %v846_v29, %v141_v28  ;;  %v357_v62 = vmax.f32 %v319_v55, 0.0  ;;  %v929_v28 = vld [vmem:[%s1242_s3 + $0x38] sm:$0xff]   ;;  %v930_v29 = vld [vmem:[%s1243_s5] sm:$0xff]  }
 0x11a   :  { %v321_v31 = vpop.f32.mrf.mxu0 }
 0x11b   :  { %v360_v51 = vmax.f32 %v330_v41, 0.0  ;;  %v322_v52 = vadd.f32 %v321_v31, %v131_v33  ;;  %v468_v41 = vpop.permute.xlu0 %467 }
 0x11c   :  { %v849_v32 = vpop.f32.mrf.mxu0 }
 0x11d   :  { %v343_v35 = vadd.f32 %v849_v32, %v156_v20  ;;  %v370_v58 = vpack.c.bf16 %v360_v51, %v359_v54  ;;  %v358_v59 = vmax.f32 %v322_v52, 0.0  ;;  %v351_v20 = vmax.f32 %v295_v9, 0.0 }
 0x11e   :  { %v334_v34 = vpop.f32.mrf.mxu0 }
 0x11f   :  { %v335_v38 = vadd.f32 %v334_v34, %v146_v18  ;;  %v363_v42 = vmax.f32 %v343_v35, 0.0  ;;  %v369_v1 = vpack.c.bf16 %v358_v59, %v357_v62  ;;  %v367_v18 = vpack.c.bf16 %v354_v8, %v353_v10  ;;  %v483_v34 = vpop.permute.xlu1 %482  ;;  %v458_v46 = vpop.permute.xlu0 %457 }
 0x120   :  { %v850_v37 = vpop.f32.mrf.mxu0  ;;  %v366_v22 = vpack.c.bf16 %v352_v12, %v351_v20 }
 0x121   :  { %v346_v39 = vadd.f32 %v850_v37, %v161_v25  ;;  %v361_v47 = vmax.f32 %v335_v38, 0.0  ;;  %v926_v25 = vld [vmem:[%s1242_s3 + $0x20] sm:$0xff]  }
 0x122   :  { %v337_v40 = vpop.f32.mrf.mxu0 }
 0x123   :  { %v364_v43 = vmax.f32 %v346_v39, 0.0  ;;  %v338_v44 = vadd.f32 %v337_v40, %v151_v23  ;;  %v349_v23 = vmax.f32 %v287_v21, 0.0  ;;  %v473_v39 = vpop.permute.xlu1 %472  ;;  %v448_v52 = vpop.permute.xlu0 %447 }
 0x125   :  { %v362_v48 = vmax.f32 %v338_v44, 0.0  ;;  %v372_v49 = vpack.c.bf16 %v364_v43, %v363_v42  ;;  %v365_v24 = vpack.c.bf16 %v350_v16, %v349_v23 }
 0x127   :  { %v371_v53 = vpack.c.bf16 %v362_v48, %v361_v47  ;;  %851 = vmatprep.subr.bf16.mxu1 %v372_v49  ;;  %v463_v44 = vpop.permute.xlu1 %462  ;;  %v438_v2 = vpop.permute.xlu0 %437 }
 0x128   :  { %852 = vmatpush3.bf16.msra.mxu1 %v372_v49 }
 0x129   :  { %853 = vmatprep.subr.bf16.mxu1 %v371_v53 }
 0x12b   :  { %v453_v49 = vpop.permute.xlu1 %452  ;;  %v428_v12 = vpop.permute.xlu0 %427 }
 0x12c   :  { %854 = vmatpush3.bf16.msra.mxu1 %v371_v53 }
 0x12d   :  { %855 = vmatprep.subr.bf16.mxu1 %v370_v58 }
 0x12f   :  { %v443_v61 = vpop.permute.xlu1 %442 }
 0x130   :  { %856 = vmatpush3.bf16.msra.mxu1 %v370_v58 }
 0x131   :  { %857 = vmatprep.subr.bf16.mxu1 %v369_v1 }
 0x133   :  { %v433_v8 = vpop.permute.xlu1 %432 }
 0x134   :  { %858 = vmatpush3.bf16.msra.mxu1 %v369_v1 }
 0x135   :  { %859 = vmatprep.subr.bf16.mxu1 %v368_v7 }
 0x138   :  { %860 = vmatpush3.bf16.msra.mxu1 %v368_v7 }
 0x139   :  { %861 = vmatprep.subr.bf16.mxu1 %v367_v18 }
 0x13c   :  { %862 = vmatpush3.bf16.msra.mxu1 %v367_v18 }
 0x13d   :  { %863 = vmatprep.subr.bf16.mxu1 %v366_v22 }
 0x140   :  { %864 = vmatpush3.bf16.msra.mxu1 %v366_v22  ;;  %v423_v22 = vpop.permute.xlu1 %422 }
 0x141   :  { %865 = vmatprep.subr.bf16.mxu1 %v365_v24 }
 0x144   :  { %866 = vmatpush3.bf16.msra.mxu1 %v365_v24  ;;  %v418_v24 = vpop.permute.xlu0 %417 }
 0x147   :  { %868 = vmatmul.mubr.bf16.vlgmr.msra.gmra.mxu1 %v923_v14 }
 0x148   :  { %871 = vmatprep.mubr.bf16.mxu1 %v924_v17 }
 0x14f   :  { %872 = vmatmul.mubr.bf16.gmra.mxu1 %v925_v15 }
 0x150   :  { %875 = vmatprep.mubr.bf16.mxu1 %v926_v25 }
 0x157   :  { %876 = vmatmul.mubr.bf16.gmra.mxu1 %v927_v26 }
 0x158   :  { %879 = vmatprep.mubr.bf16.mxu1 %v928_v27  ;;  %v413_v27 = vpop.permute.xlu1 %412 }
 0x15f   :  { %880 = vmatmul.mubr.bf16.gmra.mxu1 %v929_v28 }
 0x160   :  { %899 = vmatprep.mubr.bf16.mxu1 %v930_v29 }
 0x207   :  { %v1213_v30 = vpop.f32.mrf.mxu1 }
 0x208   :  { %v576_v25 = vadd.f32 %v1213_v30, %v418_v24  ;;  %v931_v30 = vld [vmem:[%s1243_s5 + $0x8] sm:$0xff]  }
 0x209   :  { %v1215_v31 = vpop.f32.mrf.mxu1 }
 0x20b   :  { %v870_v32 = vpop.f32.mrf.mxu1 }
 0x20c   :  { %v579_v14 = vadd.f32 %v870_v32, %v423_v22 }
 0x20d   :  { %v1217_v33 = vpop.f32.mrf.mxu1 }
 0x20e   :  { %v633_v28 = vmax.f32 %v579_v14, 0.0  ;;  %v571_v29 = vadd.f32 %v1217_v33, %v413_v27 }
 0x20f   :  { %v873_v35 = vpop.f32.mrf.mxu1 }
 0x210   :  { %v592_v13 = vadd.f32 %v873_v35, %v438_v2  ;;  %v408_v35 = vpop.permute.xlu0 %407  ;;  %v631_v32 = vmax.f32 %v571_v29, 0.0 }
 0x211   :  { %v583_v37 = vpop.f32.mrf.mxu1 }
 0x212   :  { %v636_v16 = vmax.f32 %v592_v13, 0.0  ;;  %v584_v23 = vadd.f32 %v583_v37, %v428_v12  ;;  %v568_v37 = vadd.f32 %v1215_v31, %v408_v35 }
 0x213   :  { %v874_v38 = vpop.f32.mrf.mxu1 }
 0x214   :  { %v595_v9 = vadd.f32 %v874_v38, %v443_v61  ;;  %v634_v26 = vmax.f32 %v584_v23, 0.0  ;;  %v665_v33 = vpop.permute.xlu0 %664 }
 0x215   :  { %v586_v40 = vpop.f32.mrf.mxu1 }
 0x216   :  { %v637_v19 = vmax.f32 %v595_v9, 0.0  ;;  %v587_v20 = vadd.f32 %v586_v40, %v433_v8 }
 0x217   :  { %v877_v42 = vpop.f32.mrf.mxu1 }
 0x218   :  { %v608_v62 = vadd.f32 %v877_v42, %v458_v46  ;;  %v649_v17 = vpack.c.bf16 %v637_v19, %v636_v16  ;;  %v635_v15 = vmax.f32 %v587_v20, 0.0  ;;  %v675_v42 = vpop.permute.xlu0 %674 }
 0x219   :  { %v599_v43 = vpop.f32.mrf.mxu1 }
 0x21a   :  { %v640_v6 = vmax.f32 %v608_v62, 0.0  ;;  %v600_v7 = vadd.f32 %v599_v43, %v448_v52 }
 0x21b   :  { %v878_v45 = vpop.f32.mrf.mxu1 }
 0x21c   :  { %v611_v57 = vadd.f32 %v878_v45, %v463_v44  ;;  %v638_v18 = vmax.f32 %v600_v7, 0.0 }
 0x21d   :  { %v602_v47 = vpop.f32.mrf.mxu1 }
 0x21e   :  { %v641_v3 = vmax.f32 %v611_v57, 0.0  ;;  %v603_v4 = vadd.f32 %v602_v47, %v453_v49 }
 0x21f   :  { %v881_v48 = vpop.f32.mrf.mxu1 }
 0x220   :  { %v624_v51 = vadd.f32 %v881_v48, %v478_v36  ;;  %v651_v10 = vpack.c.bf16 %v641_v3, %v640_v6  ;;  %v639_v11 = vmax.f32 %v603_v4, 0.0  ;;  %v632_v36 = vmax.f32 %v576_v25, 0.0 }
 0x221   :  { %v615_v50 = vpop.f32.mrf.mxu1 }
 0x222   :  { %v616_v54 = vadd.f32 %v615_v50, %v468_v41  ;;  %v644_v58 = vmax.f32 %v624_v51, 0.0  ;;  %v650_v21 = vpack.c.bf16 %v639_v11, %v638_v18  ;;  %v647_v38 = vpack.c.bf16 %v633_v28, %v632_v36  ;;  %v670_v41 = vpop.permute.xlu1 %669 }
 0x223   :  { %v882_v53 = vpop.f32.mrf.mxu1 }
 0x224   :  { %v627_v55 = vadd.f32 %v882_v53, %v483_v34  ;;  %v642_v63 = vmax.f32 %v616_v54, 0.0  ;;  %v648_v34 = vpack.c.bf16 %v635_v15, %v634_v26 }
 0x225   :  { %v618_v56 = vpop.f32.mrf.mxu1 }
 0x226   :  { %v645_v59 = vmax.f32 %v627_v55, 0.0  ;;  %v619_v60 = vadd.f32 %v618_v56, %v473_v39  ;;  %v630_v39 = vmax.f32 %v568_v37, 0.0  ;;  %v680_v46 = vpop.permute.xlu1 %679 }
 0x228   :  { %v653_v0 = vpack.c.bf16 %v645_v59, %v644_v58  ;;  %v643_v1 = vmax.f32 %v619_v60, 0.0  ;;  %v646_v40 = vpack.c.bf16 %v631_v32, %v630_v39 }
 0x22a   :  { %v652_v5 = vpack.c.bf16 %v643_v1, %v642_v63  ;;  %883 = vmatprep.subr.bf16.mxu1 %v653_v0 }
 0x22b   :  { %884 = vmatpush3.bf16.msra.mxu1 %v653_v0 }
 0x22c   :  { %885 = vmatprep.subr.bf16.mxu1 %v652_v5 }
 0x22f   :  { %886 = vmatpush3.bf16.msra.mxu1 %v652_v5 }
 0x230   :  { %887 = vmatprep.subr.bf16.mxu1 %v651_v10 }
 0x233   :  { %888 = vmatpush3.bf16.msra.mxu1 %v651_v10 }
 0x234   :  { %889 = vmatprep.subr.bf16.mxu1 %v650_v21 }
 0x237   :  { %890 = vmatpush3.bf16.msra.mxu1 %v650_v21 }
 0x238   :  { %891 = vmatprep.subr.bf16.mxu1 %v649_v17 }
 0x23b   :  { %892 = vmatpush3.bf16.msra.mxu1 %v649_v17 }
 0x23c   :  { %893 = vmatprep.subr.bf16.mxu1 %v648_v34 }
 0x23f   :  { %894 = vmatpush3.bf16.msra.mxu1 %v648_v34 }
 0x240   :  { %895 = vmatprep.subr.bf16.mxu1 %v647_v38 }
 0x243   :  { %896 = vmatpush3.bf16.msra.mxu1 %v647_v38 }
 0x244   :  { %897 = vmatprep.subr.bf16.mxu1 %v646_v40 }
 0x247   :  { %898 = vmatpush3.bf16.msra.mxu1 %v646_v40 }
 0x24a   :  { %900 = vmatmul.mubr.bf16.vlgmr.msra.gmra.mxu1 %v931_v30 }
 0x30a   :  { %v901_v43 = vpop.f32.mrf.mxu1 }
 0x30b   :  { %v737_v31 = vadd.f32 %v901_v43, %v675_v42 }
 0x30c   :  { %v728_v44 = vpop.f32.mrf.mxu1 }
 0x30d   :  { %745 = vst [vmem:[%s1244_s7 + $0x10] sm:$0xff] %v737_v31  ;;  %v729_v45 = vadd.f32 %v728_v44, %v665_v33 }
 0x30e   :  { %v902_v47 = vpop.f32.mrf.mxu1 }
 0x30f   :  { %743 = vst [vmem:[%s1244_s7] sm:$0xff] %v729_v45  ;;  %v740_v48 = vadd.f32 %v902_v47, %v680_v46 }
 0x310   :  { %v731_v49 = vpop.f32.mrf.mxu1 }
 0x311   :  { %746 = vst [vmem:[%s1244_s7 + $0x18] sm:$0xff] %v740_v48  ;;  %v732_v50 = vadd.f32 %v731_v49, %v670_v41 }
 0x313   :  { %744 = vst [vmem:[%s1244_s7 + $0x8] sm:$0xff] %v732_v50 }

</bundles_post_ra>
